<compile_context>
chip_gen: v7x
topology: tpu7x:2x2x1
jax: 0.10.0
libtpu: 0.0.40
codegen_flags: <defaults>
</compile_context>

<pallas_src>
import functools

import jax
import jax.numpy as jnp
from jax import lax
from jax.experimental import pallas as pl
from jax.experimental.pallas import tpu as pltpu


def _sdpa_kernel(*refs, temperature, has_mask):
    if has_mask:
        q_ref, k_ref, v_ref, mask_ref, out_ref, attn_ref = refs
    else:
        q_ref, k_ref, v_ref, out_ref, attn_ref = refs
        mask_ref = None

    # scores = (q @ k^T) / T -> (bh, tq, Lk); native-dtype MXU, f32 accumulate.
    scores = lax.dot_general(
        q_ref[...], k_ref[...],
        dimension_numbers=(((2,), (2,)), ((0,), (0,))),
        preferred_element_type=jnp.float32)
    scores = scores * jnp.float32(1.0 / temperature)

    if mask_ref is not None:
        # mask block is (1, tq, Lk) (per-batch, broadcast over heads) or
        # (bh, tq, Lk) (pre-broadcast per batch*head); both broadcast cleanly.
        scores = jnp.where(mask_ref[...] != 0,
                           jnp.float32(-1000000000.0), scores)

    # numerically stable softmax along keys; exact reciprocal of the tiny
    # (bh, tq, 1) denominator so returned rows sum to 1 at f32 accuracy.
    m = jnp.max(scores, axis=-1, keepdims=True)
    e = jnp.exp(scores - m)
    denom = jnp.sum(e, axis=-1, keepdims=True)
    p = e * pl.reciprocal(denom, approx=False)

    # single low-precision cast, reused by the attn store and the PV matmul.
    p_low = p.astype(v_ref.dtype)
    attn_ref[...] = p_low.astype(attn_ref.dtype)  # no-op cast when dtypes match

    out = lax.dot_general(
        p_low, v_ref[...],
        dimension_numbers=(((2,), (1,)), ((0,), (0,))),
        preferred_element_type=jnp.float32)
    out_ref[...] = out.astype(out_ref.dtype)


def scaled_dot_product_attention(q, k, v, mask=None, *, temperature=1.0,
                                 block_q=None, block_bh=None):
    """mode='softmax' forward of ScaledDotProductAttention_2 (eval dropout)."""
    B, H, Lq, Dk = q.shape
    Lk = k.shape[2]
    Dv = v.shape[3]
    BH = B * H
    out_dtype = q.dtype
    isz = jnp.dtype(q.dtype).itemsize
    has_mask = mask is not None

    # ---- normalize mask to (B, Lq, Lk) with an integer dtype ---------------
    if has_mask:
        mask = jnp.asarray(mask)
        if mask.ndim == 4:
            if mask.shape[1] != 1:
                raise NotImplementedError("mask must broadcast over heads")
            mask = mask[:, 0]
        elif mask.ndim == 2:
            mask = mask[None]
        mask = jnp.broadcast_to(mask, (B, Lq, Lk))
        if mask.dtype == jnp.bool_ or jnp.issubdtype(mask.dtype, jnp.floating):
            mask = mask.astype(jnp.int8)  # cheap; skipped for int-dtype callers
        msz = jnp.dtype(mask.dtype).itemsize
    else:
        msz = 0

    # ---- VMEM budget from the local chip's physical capacity ---------------
    try:
        vmem_cap = int(pltpu.get_tpu_info().vmem_capacity_bytes)
    except Exception:
        vmem_cap = 64 * 1024 * 1024            # conservative default (v7x)
    budget = int(vmem_cap * 0.55)              # working-set target for blocks

    Lq8 = ((Lq + 7) // 8) * 8

    def _est(bh_, tq_, per_bh_mask_):
        mrows = bh_ if per_bh_mask_ else 1
        bts = 2 * bh_ * tq_ * Dk * isz                 # q  (double buffered)
        bts += 2 * bh_ * Lk * Dk * isz                 # k
        bts += 2 * bh_ * Lk * Dv * isz                 # v
        if has_mask:
            bts += 2 * mrows * tq_ * Lk * msz          # mask
        bts += 2 * bh_ * tq_ * Dv * isz                # out
        bts += 2 * bh_ * tq_ * Lk * isz                # attn weights
        bts += 3 * bh_ * tq_ * Lk * 4                  # f32 scores / exp / p
        return bts

    def _max_tq(bh_, per_bh_mask_):
        cap = Lq8 if Lq8 <= 512 else 512
        t = cap
        while t > 8 and _est(bh_, t, per_bh_mask_) > budget:
            t -= 8
        return t

    # Tiny problems: fuse batch and heads into a single block (grid-step
    # overhead would otherwise dominate); mask is then pre-broadcast per (b,h).
    fuse_batch = (Lq * Lk <= 128 * 128) and \
                 ((not has_mask) or BH * Lq * Lk * msz <= (4 << 20))

    if block_bh is not None:
        bh = max(1, min(int(block_bh), BH))
        while BH % bh:
            bh -= 1
    else:
        cands = ([d for d in range(BH, 0, -1) if BH % d == 0] if fuse_batch
                 else [d for d in range(H, 0, -1) if H % d == 0])
        bh = cands[-1]
        for c in cands:
            pbm = has_mask and (fuse_batch or (H % c != 0))
            if _max_tq(c, pbm) >= min(Lq8, 256):
                bh = c
                break

    mask_per_bh = has_mask and (fuse_batch or (H % bh != 0))
    tq = _max_tq(bh, mask_per_bh)
    if block_q is not None:
        tq = min(Lq8, max(8, ((int(block_q) + 7) // 8) * 8))
    Lq_pad = ((Lq + tq - 1) // tq) * tq
    grid = (BH // bh, Lq_pad // tq)

    # ---- reshape to (B*H, ...) and pad Lq to a multiple of the q tile ------
    q3 = q.reshape(BH, Lq, Dk)
    k3 = k.reshape(BH, Lk, Dk)
    v3 = v.reshape(BH, Lk, Dv)
    if has_mask and mask_per_bh:
        mask = jnp.broadcast_to(mask[:, None], (B, H, Lq, Lk)).reshape(BH, Lq, Lk)
    if Lq_pad != Lq:
        q3 = jnp.pad(q3, ((0, 0), (0, Lq_pad - Lq), (0, 0)))
        if has_mask:
            mask = jnp.pad(mask, ((0, 0), (0, Lq_pad - Lq), (0, 0)))

    need = _est(bh, tq, mask_per_bh)
    vmem_limit = max(32 * 1024 * 1024,
                     min(int(vmem_cap * 0.72), int(need * 1.5) + (4 << 20)))

    kernel = functools.partial(_sdpa_kernel, temperature=float(temperature),
                               has_mask=has_mask)
    out_shapes = (jax.ShapeDtypeStruct((BH, Lq_pad, Dv), out_dtype),
                  jax.ShapeDtypeStruct((BH, Lq_pad, Lk), out_dtype))

    in_specs = [
        pl.BlockSpec((bh, tq, Dk), lambda g, qi: (g, qi, 0)),
        pl.BlockSpec((bh, Lk, Dk), lambda g, qi: (g, 0, 0)),   # reused over qi
        pl.BlockSpec((bh, Lk, Dv), lambda g, qi: (g, 0, 0)),   # reused over qi
    ]
    args = [q3, k3, v3]
    if has_mask:
        if mask_per_bh:
            in_specs.append(pl.BlockSpec((bh, tq, Lk), lambda g, qi: (g, qi, 0)))
        else:
            # one mask row per batch, shared by all head blocks of that batch
            in_specs.append(pl.BlockSpec(
                (1, tq, Lk), lambda g, qi: ((g * bh) // H, qi, 0)))
        args.append(mask)

    out_specs = (
        pl.BlockSpec((bh, tq, Dv), lambda g, qi: (g, qi, 0)),
        pl.BlockSpec((bh, tq, Lk), lambda g, qi: (g, qi, 0)),
    )

    grid_spec = pltpu.PrefetchScalarGridSpec(
        num_scalar_prefetch=0, grid=grid,
        in_specs=in_specs, out_specs=out_specs)

    out3, attn3 = pl.pallas_call(
        kernel,
        out_shape=out_shapes,
        grid_spec=grid_spec,
        compiler_params=pltpu.CompilerParams(
            # q-tile axis stays on one core so K/V (constant along it) are
            # fetched once per (batch*head) block, not once per core.
            dimension_semantics=("parallel", "arbitrary"),
            vmem_limit_bytes=int(vmem_limit)),
    )(*args)

    if Lq_pad != Lq:
        out3 = out3[:, :Lq]
        attn3 = attn3[:, :Lq]
    return out3.reshape(B, H, Lq, Dv), attn3.reshape(B, H, Lq, Lk)


def _reference(q, k, v, mask, temperature):
    qf = q.astype(jnp.float32) / jnp.float32(temperature)
    scores = jnp.einsum("bhqd,bhkd->bhqk", qf, k.astype(jnp.float32))
    if mask is not None:
        m = jnp.asarray(mask)
        if m.ndim == 3:
            m = m[:, None]
        elif m.ndim == 2:
            m = m[None, None]
        scores = jnp.where(m != 0, jnp.float32(-1000000000.0), scores)
    p = jax.nn.softmax(scores, axis=-1)
    out = jnp.einsum("bhqk,bhkd->bhqd", p, v.astype(jnp.float32))
    return out, p


def _causal_mask(B, Lq, Lk):
    m = (jnp.arange(Lk)[None, :] > jnp.arange(Lq)[:, None]).astype(jnp.int8)
    return jnp.broadcast_to(m, (B, 1, Lq, Lk))


if __name__ == "__main__":
    root = jax.random.PRNGKey(0)
    keys = jax.random.split(root, 10)

    # ---------- test 1: tiny masked f32 (whole problem in one grid step) ----
    B, H, Lq, Lk, Dk, Dv = 2, 2, 8, 8, 16, 16
    T = float(Dk) ** 0.5
    q = jax.random.normal(keys[0], (B, H, Lq, Dk), jnp.float32)
    k = jax.random.normal(keys[1], (B, H, Lk, Dk), jnp.float32)
    v = jax.random.normal(keys[2], (B, H, Lk, Dv), jnp.float32)
    mask = _causal_mask(B, Lq, Lk)

    out, attn = jax.block_until_ready(
        scaled_dot_product_attention(q, k, v, mask, temperature=T))
    ref_o, ref_a = _reference(q, k, v, mask, T)
    assert out.shape == (B, H, Lq, Dv) and attn.shape == (B, H, Lq, Lk)
    assert jnp.allclose(out, ref_o, atol=3e-2, rtol=3e-2), "tiny out mismatch"
    assert jnp.allclose(attn, ref_a, atol=3e-2, rtol=3e-2), "tiny attn mismatch"
    assert jnp.allclose(attn.sum(-1), 1.0, atol=1e-3), "tiny attn not normalized"

    # ---------- test 2: head-blocked and q-tiled masked f32 paths -----------
    B2, H2, L2, D2 = 2, 2, 256, 64
    T2 = float(D2) ** 0.5
    q2 = jax.random.normal(keys[3], (B2, H2, L2, D2), jnp.float32)
    k2 = jax.random.normal(keys[4], (B2, H2, L2, D2), jnp.float32)
    v2 = jax.random.normal(keys[5], (B2, H2, L2, D2), jnp.float32)
    mask2 = _causal_mask(B2, L2, L2)
    ref_o2, ref_a2 = _reference(q2, k2, v2, mask2, T2)

    out2a, attn2a = jax.block_until_ready(
        scaled_dot_product_attention(q2, k2, v2, mask2, temperature=T2))
    out2b, attn2b = jax.block_until_ready(
        scaled_dot_product_attention(q2, k2, v2, mask2, temperature=T2,
                                     block_q=128, block_bh=1))
    # vs reference: loose (absorbs TPU default-precision f32 matmul noise)
    assert jnp.allclose(out2a, ref_o2, atol=5e-2, rtol=5e-2), "2a out mismatch"
    assert jnp.allclose(attn2a, ref_a2, atol=5e-2, rtol=5e-2), "2a attn mismatch"
    assert jnp.allclose(out2b, ref_o2, atol=5e-2, rtol=5e-2), "2b out mismatch"
    assert jnp.allclose(attn2b, ref_a2, atol=5e-2, rtol=5e-2), "2b attn mismatch"
    # structural cross-check between the two tilings (tight)
    assert jnp.allclose(out2a, out2b, atol=1e-2, rtol=1e-2), "tiling out mismatch"
    assert jnp.allclose(attn2a, attn2b, atol=1e-2, rtol=1e-2), "tiling attn mismatch"
    assert jnp.allclose(attn2a.sum(-1), 1.0, atol=1e-3), "attn rows not normalized"

    # ---------- test 3: no mask, non-multiple-of-8 Lq (padding path) --------
    B3, H3, Lq3, Lk3, D3 = 2, 2, 50, 64, 32
    T3 = float(D3) ** 0.5
    qa = jax.random.normal(keys[6], (B3, H3, Lq3, D3), jnp.float32)
    ka = jax.random.normal(keys[7], (B3, H3, Lk3, D3), jnp.float32)
    va = jax.random.normal(keys[8], (B3, H3, Lk3, D3), jnp.float32)
    ref_o3, ref_a3 = _reference(qa, ka, va, None, T3)
    out3, attn3 = jax.block_until_ready(
        scaled_dot_product_attention(qa, ka, va, None, temperature=T3))
    assert out3.shape == (B3, H3, Lq3, D3) and attn3.shape == (B3, H3, Lq3, Lk3)
    assert jnp.allclose(out3, ref_o3, atol=5e-2, rtol=5e-2), "padded out mismatch"
    assert jnp.allclose(attn3, ref_a3, atol=5e-2, rtol=5e-2), "padded attn mismatch"
    assert jnp.allclose(attn3.sum(-1), 1.0, atol=1e-3), "padded attn not normalized"

    # ---------- test 4: bf16 fast path (f32 accumulation inside) ------------
    qb, kb, vb = (x.astype(jnp.bfloat16) for x in (q, k, v))
    outb, attnb = jax.block_until_ready(
        scaled_dot_product_attention(qb, kb, vb, mask, temperature=T))
    assert outb.dtype == jnp.bfloat16 and attnb.dtype == jnp.bfloat16
    assert jnp.allclose(outb.astype(jnp.float32), ref_o, atol=7e-2, rtol=7e-2), \
        "bf16 out mismatch"
    assert jnp.allclose(attnb.astype(jnp.float32).sum(-1), 1.0, atol=2e-2), \
        "bf16 attn rows not normalized"

    print("KERNEL_OK")
</pallas_src>

<mosaic_0001>
module attributes {stable_mosaic.version = 11 : i64} {
  func.func @_sdpa_kernel(%arg0: i32, %arg1: i32, %arg2: memref<4x8x16xf32, #tpu.memory_space<vmem>>, %arg3: memref<4x8x16xf32, #tpu.memory_space<vmem>>, %arg4: memref<4x8x16xf32, #tpu.memory_space<vmem>>, %arg5: memref<4x8x8xi8, #tpu.memory_space<vmem>>, %arg6: memref<4x8x16xf32, #tpu.memory_space<vmem>>, %arg7: memref<4x8x8xf32, #tpu.memory_space<vmem>>) attributes {dimension_semantics = [#tpu.dimension_semantics<parallel>, #tpu.dimension_semantics<arbitrary>], iteration_bounds = array<i64: 1, 1>, scalar_prefetch = 0 : i64, scratch_operands = 0 : i64, tpu.core_type = #tpu.core_type<tc>, window_params = [{transform_indices = @transform_0, window_bounds = array<i64: 4, 8, 16>}, {transform_indices = @transform_1, window_bounds = array<i64: 4, 8, 16>}, {transform_indices = @transform_2, window_bounds = array<i64: 4, 8, 16>}, {transform_indices = @transform_3, window_bounds = array<i64: 4, 8, 8>}, {transform_indices = @transform_4, window_bounds = array<i64: 4, 8, 16>}, {transform_indices = @transform_5, window_bounds = array<i64: 4, 8, 8>}]} {
    %c0 = arith.constant 0 : index
    %c0_0 = arith.constant 0 : index
    %c0_1 = arith.constant 0 : index
    %0 = vector.load %arg2[%c0, %c0_0, %c0_1] : memref<4x8x16xf32, #tpu.memory_space<vmem>>, vector<4x8x16xf32>
    %c0_2 = arith.constant 0 : index
    %c0_3 = arith.constant 0 : index
    %c0_4 = arith.constant 0 : index
    %1 = vector.load %arg3[%c0_2, %c0_3, %c0_4] : memref<4x8x16xf32, #tpu.memory_space<vmem>>, vector<4x8x16xf32>
    %cst = arith.constant dense<0.000000e+00> : vector<4x8x8xf32>
    %2 = tpu.matmul %0, %1, %cst {dimension_numbers = #tpu.dot_dimension_numbers<[2], [2], [1], [1], [0, 0, 0, 1, 1, 1], [0], [0]>} : vector<4x8x16xf32>, vector<4x8x16xf32>, vector<4x8x8xf32> -> vector<4x8x8xf32>
    %cst_5 = arith.constant 2.500000e-01 : f32
    %3 = vector.broadcast %cst_5 : f32 to vector<4x8x8xf32>
    %4 = arith.mulf %2, %3 : vector<4x8x8xf32>
    %c0_6 = arith.constant 0 : index
    %c0_7 = arith.constant 0 : index
    %c0_8 = arith.constant 0 : index
    %5 = vector.load %arg5[%c0_6, %c0_7, %c0_8] : memref<4x8x8xi8, #tpu.memory_space<vmem>>, vector<4x8x8xi8>
    %c0_i8 = arith.constant 0 : i8
    %6 = vector.broadcast %c0_i8 : i8 to vector<4x8x8xi8>
    %7 = arith.cmpi ne, %5, %6 : vector<4x8x8xi8>
    %cst_9 = arith.constant -1.000000e+09 : f32
    %8 = vector.broadcast %cst_9 : f32 to vector<4x8x8xf32>
    %9 = arith.select %7, %8, %4 : vector<4x8x8xi1>, vector<4x8x8xf32>
    %cst_10 = arith.constant dense<0xFF800000> : vector<4x8xf32>
    %10 = vector.multi_reduction <maximumf>, %9, %cst_10 [2] : vector<4x8x8xf32> to vector<4x8xf32>
    %11 = vector.shape_cast %10 : vector<4x8xf32> to vector<4x8x1xf32>
    %12 = vector.broadcast %11 : vector<4x8x1xf32> to vector<4x8x8xf32>
    %13 = arith.subf %9, %12 : vector<4x8x8xf32>
    %14 = math.exp %13 : vector<4x8x8xf32>
    %cst_11 = arith.constant dense<0.000000e+00> : vector<4x8xf32>
    %15 = vector.multi_reduction <add>, %14, %cst_11 [2] : vector<4x8x8xf32> to vector<4x8xf32>
    %16 = vector.shape_cast %15 : vector<4x8xf32> to vector<4x8x1xf32>
    %17 = tpu.reciprocal %16 : vector<4x8x1xf32> -> vector<4x8x1xf32>
    %18 = vector.broadcast %17 : vector<4x8x1xf32> to vector<4x8x8xf32>
    %19 = arith.mulf %14, %18 : vector<4x8x8xf32>
    %c0_12 = arith.constant 0 : index
    %c0_13 = arith.constant 0 : index
    %c0_14 = arith.constant 0 : index
    %20 = vector.load %arg7[%c0_12, %c0_13, %c0_14] : memref<4x8x8xf32, #tpu.memory_space<vmem>>, vector<4x8x8xf32>
    tpu.vector_store %arg7[%c0_12, %c0_13, %c0_14], %19 {strides = array<i32>} : memref<4x8x8xf32, #tpu.memory_space<vmem>>, vector<4x8x8xf32>,
    %c0_15 = arith.constant 0 : index
    %c0_16 = arith.constant 0 : index
    %c0_17 = arith.constant 0 : index
    %21 = vector.load %arg4[%c0_15, %c0_16, %c0_17] : memref<4x8x16xf32, #tpu.memory_space<vmem>>, vector<4x8x16xf32>
    %cst_18 = arith.constant dense<0.000000e+00> : vector<4x8x16xf32>
    %22 = tpu.matmul %19, %21, %cst_18 {dimension_numbers = #tpu.dot_dimension_numbers<[2], [1], [1], [2], [0, 0, 0, 1, 1, 2], [0], [0]>} : vector<4x8x8xf32>, vector<4x8x16xf32>, vector<4x8x16xf32> -> vector<4x8x16xf32>
    %c0_19 = arith.constant 0 : index
    %c0_20 = arith.constant 0 : index
    %c0_21 = arith.constant 0 : index
    %23 = vector.load %arg6[%c0_19, %c0_20, %c0_21] : memref<4x8x16xf32, #tpu.memory_space<vmem>>, vector<4x8x16xf32>
    tpu.vector_store %arg6[%c0_19, %c0_20, %c0_21], %22 {strides = array<i32>} : memref<4x8x16xf32, #tpu.memory_space<vmem>>, vector<4x8x16xf32>,
    return
  }
  func.func @transform_0(%arg0: i32, %arg1: i32) -> (i32, i32, i32) {
    %c0_i32 = arith.constant 0 : i32
    %c0_i32_0 = arith.constant 0 : i32
    return %arg0, %arg1, %c0_i32 : i32, i32, i32
  }
  func.func @transform_1(%arg0: i32, %arg1: i32) -> (i32, i32, i32) {
    %c0_i32 = arith.constant 0 : i32
    %c0_i32_0 = arith.constant 0 : i32
    %c0_i32_1 = arith.constant 0 : i32
    return %arg0, %c0_i32, %c0_i32_0 : i32, i32, i32
  }
  func.func @transform_2(%arg0: i32, %arg1: i32) -> (i32, i32, i32) {
    %c0_i32 = arith.constant 0 : i32
    %c0_i32_0 = arith.constant 0 : i32
    %c0_i32_1 = arith.constant 0 : i32
    return %arg0, %c0_i32, %c0_i32_0 : i32, i32, i32
  }
  func.func @transform_3(%arg0: i32, %arg1: i32) -> (i32, i32, i32) {
    %c0_i32 = arith.constant 0 : i32
    %c0_i32_0 = arith.constant 0 : i32
    return %arg0, %arg1, %c0_i32 : i32, i32, i32
  }
  func.func @transform_4(%arg0: i32, %arg1: i32) -> (i32, i32, i32) {
    %c0_i32 = arith.constant 0 : i32
    %c0_i32_0 = arith.constant 0 : i32
    return %arg0, %arg1, %c0_i32 : i32, i32, i32
  }
  func.func @transform_5(%arg0: i32, %arg1: i32) -> (i32, i32, i32) {
    %c0_i32 = arith.constant 0 : i32
    %c0_i32_0 = arith.constant 0 : i32
    return %arg0, %arg1, %c0_i32 : i32, i32, i32
  }
}

</mosaic_0001>

<bundles_post_ra>
// kernel: tpu_custom_call.1
= control target key start
LH: loop header
LB: loop body
LE: loop exit
PB: predicated region body
PF: predicated region fallthrough
CT: control target
= control target key end

     0   :  { %11 = vsyncpa [#allocation3], 0  ;;  %s1186_s0 = inlined_call_operand.hbm [shape: f32[4,8,16], index: 0, kind: input, shape index: {}]   ;;  %s1187_s1 = inlined_call_operand.hbm [shape: f32[4,8,16], index: 1, kind: input, shape index: {}]   ;;  %s1188_s2 = inlined_call_operand.hbm [shape: f32[4,8,16], index: 2, kind: input, shape index: {}]   ;;  %s1189_s3 = inlined_call_operand.vmem [shape: s8[4,8,8], index: 3, kind: input, shape index: {}]   ;;  %s1190_s4 = inlined_call_operand.hbm [shape: f32[4,8,16], index: 4, kind: output, shape index: {0}]   ;;  %s1191_s5 = inlined_call_operand.hbm [shape: f32[4,8,8], index: 5, kind: output, shape index: {1}]  }
   0x1   :  { %12 = vsyncpa [#allocation6], 0 }
   0x2   :  { %13 = vsyncpa [#allocation4], 0 }
   0x3   :  { %14 = vsyncpa [#allocation10], 0  ;;  %s1000_s18 = smov [#allocation5]   ;;  %s1001_s20 = smov [#allocation2]  }
   0x4   :  { %s32_s19 = sshll.u32 %s1000_s18, 4  ;;  %s20_s21 = sshll.u32 %s1001_s20, 4  ;;  %s33_s19 = int_to_ptr.vmem [resolvable:$true] %s32_s19  ;;  %s1040_s21 = int_to_ptr.vmem [resolvable:$true] %s20_s21 }
   0x5   :  { %s882_s24 = scalar_lea.hbm %s1187_s1, 512 }
   0x6   :  { %p883_p0 = scmp.ne.s32.totalorder %s1187_s1, %s882_s24  ;;  %p886_p1 = scmp.lt.u32.totalorder %s882_s24, %s1187_s1 }
   0x8   :  { %p888_p2 = pnand %p886_p1, %p883_p0 }
   0xa   :  { %891 = shalt.err (!%p888_p2)
}
   0xb   :  { %s892_s29 = scalar_lea.vmem %s33_s19, 512  ;;  %p897_p4 = scmp.lt.s32.totalorder %s33_s19, %s33_s19 }
   0xc   :  { %p893_p3 = scmp.ne.s32.totalorder %s33_s19, %s892_s29  ;;  %p898_p5 = scmp.lt.s32.totalorder %s892_s29, %s892_s29 }
   0xe   :  { %p899_p6 = por %p898_p5, %p897_p4 }
  0x10   :  { %p900_p7 = pnand %p899_p6, %p893_p3 }
  0x12   :  { %903 = shalt.err (!%p900_p7)
}
  0x13   :  { %s1002_s30 = smov 128   ;;  %s1003_s6 = smov 8  }
  0x14   :  { %38 = dma.hbm_to_vmem [thread:$0]  %s1187_s1, 512, %s33_s19, [#allocation6], %s1002_s30, %s1002_s30, %s1003_s6  }
  0x15   :  { %s904_s11 = scalar_lea.hbm %s1186_s0, 512 }
  0x16   :  { %p905_p8 = scmp.ne.s32.totalorder %s1186_s0, %s904_s11  ;;  %p908_p9 = scmp.lt.u32.totalorder %s904_s11, %s1186_s0 }
  0x18   :  { %p910_p10 = pnand %p908_p9, %p905_p8 }
  0x1a   :  { %913 = shalt.err (!%p910_p10)
}
  0x1b   :  { %s914_s16 = scalar_lea.vmem %s1040_s21, 512  ;;  %p919_p12 = scmp.lt.s32.totalorder %s1040_s21, %s1040_s21 }
  0x1c   :  { %p915_p11 = scmp.ne.s32.totalorder %s1040_s21, %s914_s16  ;;  %p920_p13 = scmp.lt.s32.totalorder %s914_s16, %s914_s16 }
  0x1e   :  { %p921_p0 = por %p920_p13, %p919_p12 }
  0x20   :  { %p922_p1 = pnand %p921_p0, %p915_p11 }
  0x22   :  { %925 = shalt.err (!%p922_p1)
}
  0x23   :  { %26 = dma.hbm_to_vmem [thread:$0]  %s1186_s0, 512, %s1040_s21, [#allocation3], %s1002_s30, %s1002_s30, %s1003_s6  }
  0x24   :  { %s1004_s18 = smov [#allocation7]   ;;  %s926_s23 = scalar_lea.hbm %s1188_s2, 512 }
  0x25   :  { %s44_s19 = sshll.u32 %s1004_s18, 4  ;;  %p927_p2 = scmp.ne.s32.totalorder %s1188_s2, %s926_s23  ;;  %s45_s19 = int_to_ptr.vmem [resolvable:$true] %s44_s19 }
  0x26   :  { %p930_p3 = scmp.lt.u32.totalorder %s926_s23, %s1188_s2 }
  0x28   :  { %p932_p4 = pnand %p930_p3, %p927_p2 }
  0x2a   :  { %935 = shalt.err (!%p932_p4)
}
  0x2b   :  { %s936_s28 = scalar_lea.vmem %s45_s19, 512  ;;  %p941_p6 = scmp.lt.s32.totalorder %s45_s19, %s45_s19 }
  0x2c   :  { %p937_p5 = scmp.ne.s32.totalorder %s45_s19, %s936_s28  ;;  %p942_p7 = scmp.lt.s32.totalorder %s936_s28, %s936_s28 }
  0x2e   :  { %p943_p8 = por %p942_p7, %p941_p6 }
  0x30   :  { %p944_p9 = pnand %p943_p8, %p937_p5 }
  0x32   :  { %947 = shalt.err (!%p944_p9)
}
  0x33   :  { %50 = dma.hbm_to_vmem [thread:$0]  %s1188_s2, 512, %s45_s19, [#allocation6], %s1002_s30, %s1002_s30, %s1003_s6  }
  0x34   :  { %992 = dma.done.wait [#allocation3], 512  }
  0x35   :  { %993 = vsyncadd [#allocation3], 4294966784 }
  0x36   :  { %994 = dma.done.wait [#allocation6], 1024  }
  0x37   :  { %995 = vsyncadd [#allocation6], 4294966272  ;;  %v1005_v0 = vmov 0.0   ;;  %vm1006_vm0 = vmmov 0   ;;  %vm72_vm1 = vcmask 130048   ;;  %v68_v1 = vld [vmem:[#allocation5] sm:$0xff] }
  0x38   :  { %816 = vmatprep.subr.mxu0 %v1005_v0  ;;  %818 = vmatprep.mubr.msk.f32.mxu0 %vm1006_vm0, %v1005_v0  ;;  %v69_v2 = vld [vmem:[#allocation5 + $0x8] sm:$0xff]  ;;  %v64_v3 = vld [vmem:[#allocation2] sm:$0xff]  ;;  %v70_v5 = vld [vmem:[#allocation5 + $0x10] sm:$0xff]  ;;  %v1007_v13 = vmov 0   ;;  %vm405_vm8 = vcmask 64512  }
  0x39   :  { %821 = vmatprep.subr.mxu1 %v1005_v0  ;;  %823 = vmatprep.mubr.msk.f32.mxu1 %vm1006_vm0, %v1005_v0  ;;  %v65_v4 = vld [vmem:[#allocation2 + $0x8] sm:$0xff]  ;;  %v71_v6 = vld [vmem:[#allocation5 + $0x18] sm:$0xff]  ;;  %v66_v7 = vld [vmem:[#allocation2 + $0x10] sm:$0xff] }
  0x3a   :  { %817 = vmatpush3.xpose.msk.msra.mxu0 %vm72_vm1, %v68_v1  ;;  %822 = vmatpush3.xpose.msk.msra.mxu1 %vm72_vm1, %v69_v2  ;;  %v67_v8 = vld [vmem:[#allocation2 + $0x18] sm:$0xff]  ;;  %v381_v9 = vld [vmem:[%s1189_s3] sm:$0x3]  ;;  %v382_v10 = vld [vmem:[%s1189_s3 + $0x2] sm:$0x3] }
  0x3b   :  { %826 = vmatprep.subr.mxu0 %v1005_v0  ;;  %831 = vmatprep.subr.mxu1 %v1005_v0  ;;  %vm385_vm2 = vnez %v381_v9  ;;  %vm386_vm3 = vnez %v382_v10  ;;  %v383_v11 = vld [vmem:[%s1189_s3 + $0x4] sm:$0x3]  ;;  %v384_v12 = vld [vmem:[%s1189_s3 + $0x6] sm:$0x3]  ;;  %v455_v63 = vld [vmem:[#allocation7 + $0x8] sm:$0xff]  ;;  %s1008_s3 = smov [#allocation9]  }
  0x3c   :  { %v389_v14 = vsel %vm385_vm2, 16843009, %v1007_v13  ;;  %v390_v15 = vsel %vm386_vm3, 16843009, %v1007_v13  ;;  %vm387_vm4 = vnez %v383_v11  ;;  %vm388_vm5 = vnez %v384_v12  ;;  %v454_v62 = vld [vmem:[#allocation7] sm:$0xff]  ;;  %v457_v11 = vld [vmem:[#allocation7 + $0x18] sm:$0xff] }
  0x3d   :  { %819 = vmatmul.mubr.msk.f32.vlgmr.msra.gmra.mrb[0].mxu0 %vm72_vm1, %v64_v3  ;;  %824 = vmatmul.mubr.msk.f32.vlgmr.msra.gmra.mrb[0].mxu1 %vm72_vm1, %v65_v4  ;;  %v393_v16 = vunpack.c.0.s8 %v389_v14  ;;  %v394_v17 = vunpack.c.0.s8 %v390_v15  ;;  %v391_v18 = vsel %vm387_vm4, 16843009, %v1007_v13  ;;  %v392_v19 = vsel %vm388_vm5, 16843009, %v1007_v13  ;;  %s771_s13 = sshll.u32 %s1008_s3, 4  ;;  %s772_s13 = int_to_ptr.vmem [resolvable:$true] %s771_s13 }
  0x3e   :  { %827 = vmatpush3.xpose.msk.msra.mxu0 %vm72_vm1, %v70_v5  ;;  %828 = vmatprep.mubr.msk.f32.mxu0 %vm1006_vm0, %v1005_v0  ;;  %v395_v22 = vunpack.c.0.s8 %v391_v18  ;;  %v396_v27 = vunpack.c.0.s8 %v392_v19  ;;  %s948_s14 = scalar_lea.vmem %s772_s13, 512  ;;  %p953_p11 = scmp.lt.s32.totalorder %s772_s13, %s772_s13 }
  0x3f   :  { %832 = vmatpush3.xpose.msk.msra.mxu1 %vm72_vm1, %v71_v6  ;;  %833 = vmatprep.mubr.msk.f32.mxu1 %vm1006_vm0, %v1005_v0  ;;  %vm397_vm6 = vcmp.ne.s32.totalorder %v393_v16, 0  ;;  %vm398_vm7 = vcmp.ne.s32.totalorder %v394_v17, 0  ;;  %p949_p10 = scmp.ne.s32.totalorder %s772_s13, %s948_s14  ;;  %p954_p12 = scmp.lt.s32.totalorder %s948_s14, %s948_s14 }
  0x40   :  { %836 = vmatprep.subr.mxu0 %v1005_v0  ;;  %841 = vmatprep.subr.mxu1 %v1005_v0  ;;  %vm399_vm9 = vcmp.ne.s32.totalorder %v395_v22, 0  ;;  %vm400_vm10 = vcmp.ne.s32.totalorder %v396_v27, 0 }
  0x41   :  { %829 = vmatmul.mubr.msk.f32.vlgmr.msra.gmra.mrb[2].mxu0 %vm72_vm1, %v66_v7  ;;  %v456_v7 = vld [vmem:[#allocation7 + $0x10] sm:$0xff]  ;;  %p955_p13 = por %p954_p12, %p953_p11 }
  0x42   :  { %834 = vmatmul.mubr.msk.f32.vlgmr.msra.gmra.mrb[2].mxu1 %vm72_vm1, %v67_v8  ;;  %838 = vmatprep.mubr.msk.f32.mxu0 %vm1006_vm0, %v1005_v0 }
  0x43   :  { %843 = vmatprep.mubr.msk.f32.mxu1 %vm1006_vm0, %v1005_v0  ;;  %837 = vmatpush3.msra.mxu0 %v454_v62  ;;  %p956_p0 = pnand %p955_p13, %p949_p10 }
  0x44   :  { %846 = vmatprep.subr.mxu0 %v1005_v0  ;;  %842 = vmatpush3.msra.mxu1 %v455_v63 }
  0x45   :  { %851 = vmatprep.subr.mxu1 %v1005_v0 }
 0x110   :  { %v145_v20 = vpop.f32.mrb[0].mxu0  ;;  %v221_v21 = vpop.f32.mrb[0].mxu1 }
 0x111   :  { %v377_v23 = vmul.f32 0.25, %v145_v20  ;;  %v820_v24 = vpop.f32.mrb[1].mxu0  ;;  %v378_v25 = vmul.f32 0.25, %v221_v21  ;;  %v825_v26 = vpop.f32.mrb[1].mxu1 }
 0x113   :  { %v401_v28 = vsel %vm397_vm6, -1e+09, %v377_v23  ;;  %v402_v29 = vsel %vm398_vm7, -1e+09, %v378_v25 }
 0x114   :  { %v297_v30 = vpop.f32.mrb[2].mxu0  ;;  %v406_v31 = vsel %vm405_vm8, %v401_v28, -inf  ;;  %v409_v37 = vsel %vm405_vm8, %v402_v29, -inf }
 0x115   :  { %v379_v32 = vmul.f32 0.25, %v297_v30  ;;  %407 = vmax.xlane.f32.xlu0 %v406_v31  ;;  %v830_v33 = vpop.f32.mrb[3].mxu0  ;;  %v373_v34 = vpop.f32.mrb[2].mxu1 }
 0x116   :  { %v380_v35 = vmul.f32 0.25, %v373_v34  ;;  %v835_v36 = vpop.f32.mrb[3].mxu1 }
 0x117   :  { %v403_v38 = vsel %vm399_vm9, -1e+09, %v379_v32 }
 0x118   :  { %v412_v39 = vsel %vm405_vm8, %v403_v38, -inf  ;;  %v404_v40 = vsel %vm400_vm10, -1e+09, %v380_v35 }
 0x119   :  { %410 = vmax.xlane.f32.xlu0 %v409_v37  ;;  %413 = vmax.xlane.f32.xlu1 %v412_v39  ;;  %v415_v41 = vsel %vm405_vm8, %v404_v40, -inf }
 0x11d   :  { %416 = vmax.xlane.f32.xlu1 %v415_v41 }
 0x1a2   :  { %v408_v42 = vpop.xlane.xlu0 %407 }
 0x1a3   :  { %v418_v43 = vsub.f32 %v401_v28, %v408_v42 }
 0x1a5   :  { %v422_v44 = vmul.f32 1.442695, %v418_v43 }
 0x1a6   :  { %v411_v45 = vpop.xlane.xlu0 %410  ;;  %v414_v46 = vpop.xlane.xlu1 %413 }
 0x1a7   :  { %866 = vpow2.f32 %v422_v44  ;;  %v419_v47 = vsub.f32 %v402_v29, %v411_v45  ;;  %v420_v48 = vsub.f32 %v403_v38, %v414_v46 }
 0x1a9   :  { %v424_v49 = vmul.f32 1.442695, %v419_v47  ;;  %v426_v50 = vmul.f32 1.442695, %v420_v48 }
 0x1aa   :  { %v417_v51 = vpop.xlane.xlu1 %416 }
 0x1ab   :  { %868 = vpow2.f32 %v424_v49  ;;  %v421_v52 = vsub.f32 %v404_v40, %v417_v51 }
 0x1ac   :  { %870 = vpow2.f32 %v426_v50 }
 0x1ad   :  { %v428_v53 = vmul.f32 1.442695, %v421_v52 }
 0x1af   :  { %872 = vpow2.f32 %v428_v53 }
 0x1b1   :  { %v867_v54 = vpop.eup %866 }
 0x1b2   :  { %v430_v55 = vsel %vm405_vm8, %v867_v54, 0.0 }
 0x1b3   :  { %431 = vadd.xlane.f32.xlu0 %v430_v55 }
 0x1b5   :  { %v869_v56 = vpop.eup %868 }
 0x1b6   :  { %v871_v57 = vpop.eup %870  ;;  %v433_v58 = vsel %vm405_vm8, %v869_v56, 0.0 }
 0x1b7   :  { %434 = vadd.xlane.f32.xlu1 %v433_v58  ;;  %v436_v59 = vsel %vm405_vm8, %v871_v57, 0.0 }
 0x1b8   :  { %437 = vadd.xlane.f32.xlu0 %v436_v59 }
 0x1b9   :  { %v873_v60 = vpop.eup %872 }
 0x1ba   :  { %v439_v61 = vsel %vm405_vm8, %v873_v60, 0.0 }
 0x1bb   :  { %440 = vadd.xlane.f32.xlu1 %v439_v61 }
 0x240   :  { %v432_v1 = vpop.xlane.xlu0 %431 }
 0x241   :  { %874 = vrcp.f32 %v432_v1 }
 0x244   :  { %v435_v2 = vpop.xlane.xlu1 %434 }
 0x245   :  { %v438_v3 = vpop.xlane.xlu0 %437  ;;  %876 = vrcp.f32 %v435_v2 }
 0x246   :  { %878 = vrcp.f32 %v438_v3 }
 0x248   :  { %v441_v4 = vpop.xlane.xlu1 %440 }
 0x249   :  { %880 = vrcp.f32 %v441_v4 }
 0x24b   :  { %v875_v5 = vpop.eup %874 }
 0x24c   :  { %v446_v6 = vmul.f32 %v875_v5, %v867_v54 }
 0x24e   :  { %450 = vst.msk [vmem:[#allocation9] sm:$0xff] %vm405_vm8, %v446_v6  ;;  %839 = vmatmul.mubr.msk.f32.vlgmr.msra.gmra.mrb[4].mxu0 %vm405_vm8, %v446_v6 }
 0x24f   :  { %v877_v8 = vpop.eup %876  ;;  %847 = vmatpush3.msra.mxu0 %v456_v7  ;;  %848 = vmatprep.mubr.msk.f32.mxu0 %vm1006_vm0, %v1005_v0 }
 0x250   :  { %v879_v9 = vpop.eup %878  ;;  %v447_v10 = vmul.f32 %v877_v8, %v869_v56 }
 0x251   :  { %v448_v12 = vmul.f32 %v879_v9, %v871_v57 }
 0x252   :  { %451 = vst.msk [vmem:[#allocation9 + $0x8] sm:$0xff] %vm405_vm8, %v447_v10  ;;  %844 = vmatmul.mubr.msk.f32.vlgmr.msra.gmra.mrb[4].mxu1 %vm405_vm8, %v447_v10 }
 0x253   :  { %v881_v13 = vpop.eup %880  ;;  %452 = vst.msk [vmem:[#allocation9 + $0x10] sm:$0xff] %vm405_vm8, %v448_v12  ;;  %849 = vmatmul.mubr.msk.f32.vlgmr.msra.gmra.mrb[6].mxu0 %vm405_vm8, %v448_v12  ;;  %852 = vmatpush3.msra.mxu1 %v457_v11 }
 0x254   :  { %v449_v14 = vmul.f32 %v881_v13, %v873_v60  ;;  %853 = vmatprep.mubr.msk.f32.mxu1 %vm1006_vm0, %v1005_v0 }
 0x256   :  { %453 = vst.msk [vmem:[#allocation9 + $0x18] sm:$0xff] %vm405_vm8, %v449_v14  ;;  %854 = vmatmul.mubr.msk.f32.vlgmr.msra.gmra.mrb[6].mxu1 %vm405_vm8, %v449_v14 }
 0x257   :  { %959 = shalt.err (!%p956_p0)
}
 0x258   :  { %s960_s1 = scalar_lea.hbm %s1191_s5, 512 }
 0x259   :  { %p961_p1 = scmp.ne.s32.totalorder %s1191_s5, %s960_s1  ;;  %p964_p2 = scmp.lt.u32.totalorder %s960_s1, %s1191_s5 }
 0x25b   :  { %p966_p3 = pnand %p964_p2, %p961_p1 }
 0x25d   :  { %969 = shalt.err (!%p966_p3)
}
 0x25e   :  { %777 = dma.vmem_to_hbm [thread:$0]  %s772_s13, 512, %s1191_s5, [#allocation10], %s1002_s30, %s1002_s30, %s1003_s6  }
 0x25f   :  { %s1009_s24 = smov [#allocation8]  }
 0x260   :  { %s759_s25 = sshll.u32 %s1009_s24, 4  ;;  %s760_s25 = int_to_ptr.vmem [resolvable:$true] %s759_s25 }
 0x261   :  { %s970_s5 = scalar_lea.vmem %s760_s25, 512  ;;  %p975_p5 = scmp.lt.s32.totalorder %s760_s25, %s760_s25 }
 0x262   :  { %p971_p4 = scmp.ne.s32.totalorder %s760_s25, %s970_s5  ;;  %p976_p6 = scmp.lt.s32.totalorder %s970_s5, %s970_s5 }
 0x264   :  { %p977_p7 = por %p976_p6, %p975_p5 }
 0x266   :  { %p978_p8 = pnand %p977_p7, %p971_p4 }
 0x321   :  { %v527_v0 = vpop.f32.mrb[4].mxu0 }
 0x322   :  { %750 = vst.msk [vmem:[#allocation8] sm:$0xff] %vm72_vm1, %v527_v0  ;;  %v840_v15 = vpop.f32.mrb[5].mxu0 }
 0x325   :  { %v600_v16 = vpop.f32.mrb[4].mxu1 }
 0x326   :  { %751 = vst.msk [vmem:[#allocation8 + $0x8] sm:$0xff] %vm72_vm1, %v600_v16  ;;  %v673_v17 = vpop.f32.mrb[6].mxu0  ;;  %v845_v18 = vpop.f32.mrb[5].mxu1 }
 0x327   :  { %752 = vst.msk [vmem:[#allocation8 + $0x10] sm:$0xff] %vm72_vm1, %v673_v17  ;;  %v850_v19 = vpop.f32.mrb[7].mxu0 }
 0x329   :  { %v746_v20 = vpop.f32.mrb[6].mxu1 }
 0x32a   :  { %753 = vst.msk [vmem:[#allocation8 + $0x18] sm:$0xff] %vm72_vm1, %v746_v20  ;;  %v855_v21 = vpop.f32.mrb[7].mxu1 }
 0x32b   :  { %981 = shalt.err (!%p978_p8)
}
 0x32c   :  { %s982_s28 = scalar_lea.hbm %s1190_s4, 512 }
 0x32d   :  { %p983_p9 = scmp.ne.s32.totalorder %s1190_s4, %s982_s28  ;;  %p986_p10 = scmp.lt.u32.totalorder %s982_s28, %s1190_s4 }
 0x32f   :  { %p988_p11 = pnand %p986_p10, %p983_p9 }
 0x331   :  { %991 = shalt.err (!%p988_p11)
}
 0x332   :  { %765 = dma.vmem_to_hbm [thread:$0]  %s760_s25, 512, %s1190_s4, [#allocation4], %s1002_s30, %s1002_s30, %s1003_s6  }
 0x333   :  { %996 = dma.done.wait [#allocation4], 512  }
 0x334   :  { %997 = vsyncadd [#allocation4], 4294966784 }
 0x335   :  { %998 = dma.done.wait [#allocation10], 512  }
 0x336   :  { %999 = vsyncadd [#allocation10], 4294966784 }
 0x337   :  { %784 = vsyncpa [#allocation3], 1 }
 0x338   :  { %785 = vsyncpa [#allocation6], 1 }
 0x339   :  { %786 = vsyncpa [#allocation4], 1 }
 0x33a   :  { %787 = vsyncpa [#allocation10], 1 }

</bundles_post_ra>
